<compile_context>
chip_gen: v5e
topology: v5e:2x2
jax: 0.10.0
libtpu: 0.0.40
codegen_flags: <defaults>
</compile_context>

<pallas_src>
import numpy as np
import jax
import jax.numpy as jnp
from jax.experimental import pallas as pl
from jax.experimental.pallas import tpu as pltpu


# --------------------------------------------------------------------------
# Pallas kernels
# --------------------------------------------------------------------------

def _embedding_lookup_kernel(ids_ref, table_ref, o_ref):
    """nn.Embedding gather, single grid step, table resident in VMEM.

    ids_ref:   (B,)              int32 in SMEM
    table_ref: (n_speaker, 1, D) f32 in VMEM (leading axis = dynamic-index axis)
    o_ref:     (B, D)            f32 in VMEM
    """
    b = o_ref.shape[0]
    for i in range(b):                       # static unroll (B is small/compile-time)
        o_ref[pl.ds(i, 1), :] = table_ref[ids_ref[i]]


def embedding_lookup_pallas(table, ids):
    """table: (n_speaker, D) f32, ids: (B,) int32 -> (B, D) f32."""
    n_spk, dim = table.shape
    (b,) = ids.shape
    ids = jnp.clip(ids.astype(jnp.int32), 0, n_spk - 1)   # guard: no VMEM OOB reads
    table3 = table.reshape(n_spk, 1, dim)                 # dynamic index on lead axis
    return pl.pallas_call(
        _embedding_lookup_kernel,
        out_shape=jax.ShapeDtypeStruct((b, dim), table.dtype),
        in_specs=[
            pl.BlockSpec(memory_space=pltpu.MemorySpace.SMEM),   # ids
            pl.BlockSpec(memory_space=pltpu.MemorySpace.VMEM),   # full table
        ],
        out_specs=pl.BlockSpec(memory_space=pltpu.MemorySpace.VMEM),
    )(ids, table3)


def _linear_kernel(x_ref, w_ref, b_ref, o_ref):
    """nn.Linear: y = x @ W^T + b, with W pre-transposed to (Din, Dout).

    x_ref: (B_pad, Din)   bf16
    w_ref: (Din, Dout)    bf16
    b_ref: (1, Dout)      f32
    o_ref: (B_pad, Dout)  f32
    """
    acc = jnp.dot(x_ref[...], w_ref[...], preferred_element_type=jnp.float32)
    o_ref[...] = acc + b_ref[...]


def linear_pallas(x_bf16, w_bf16, bias_f32):
    b, din = x_bf16.shape
    dout = w_bf16.shape[1]
    # Pad rows to a multiple of 8 -> sublane-dense (unmasked) output stores.
    b_pad = ((b + 7) // 8) * 8
    if b_pad != b:
        x_bf16 = jnp.pad(x_bf16, ((0, b_pad - b), (0, 0)))
    out = pl.pallas_call(
        _linear_kernel,
        out_shape=jax.ShapeDtypeStruct((b_pad, dout), jnp.float32),
        in_specs=[
            pl.BlockSpec(memory_space=pltpu.MemorySpace.VMEM),   # x
            pl.BlockSpec(memory_space=pltpu.MemorySpace.VMEM),   # W (Din, Dout)
            pl.BlockSpec(memory_space=pltpu.MemorySpace.VMEM),   # bias (1, Dout)
        ],
        out_specs=pl.BlockSpec(memory_space=pltpu.MemorySpace.VMEM),
    )(x_bf16, w_bf16, bias_f32)
    return out[:b]


# --------------------------------------------------------------------------
# Parameter setup + forward dispatch (plain-JAX glue)
# --------------------------------------------------------------------------

def init_params(key, n_speaker, speaker_dim, encoder_dim):
    k_tab, k_w, k_b = jax.random.split(key, 3)
    # nn.Embedding default init ~ N(0, 1); scaled down a little here.
    table = 0.1 * jax.random.normal(k_tab, (n_speaker, encoder_dim), jnp.float32)
    # nn.Linear default init: U(-1/sqrt(Din), 1/sqrt(Din)), weight (Dout, Din).
    s = 1.0 / np.sqrt(speaker_dim)
    w = jax.random.uniform(k_w, (encoder_dim, speaker_dim), jnp.float32, -s, s)
    bias = jax.random.uniform(k_b, (encoder_dim,), jnp.float32, -s, s)
    return {
        # TODO(synk): table could be stored bf16 (halves gather DMA bytes) if the
        #             model tolerates it; kept f32 here for bit-exact lookups.
        "emb_table": table,
        # Pre-transpose to (Din, Dout) and pre-cast to bf16 once (static weight).
        "lin_w_bf16": jnp.transpose(w).astype(jnp.bfloat16),
        "lin_b": bias.reshape(1, encoder_dim),
    }


def speaker_embedding_forward(params, speakers, spker_embeds, embedder_type):
    """Mirrors SpeakerEmbedding.forward(speakers, spker_embeds)."""
    if embedder_type == "embedding":
        return embedding_lookup_pallas(params["emb_table"], speakers)
    x = spker_embeds.astype(jnp.bfloat16)
    return linear_pallas(x, params["lin_w_bf16"], params["lin_b"])


# --------------------------------------------------------------------------

if __name__ == "__main__":
    B = 2
    N_SPEAKER = 8
    SPEAKER_DIM = 256   # pretrained speaker-embedder dim (e.g. GE2E)
    ENCODER_DIM = 256   # model_config[block_type]['encoder_hidden'] -> lane-dense

    root = jax.random.PRNGKey(0)
    k_param, k_ids, k_emb = jax.random.split(root, 3)
    params = init_params(k_param, N_SPEAKER, SPEAKER_DIM, ENCODER_DIM)

    speakers = jax.random.randint(k_ids, (B,), 0, N_SPEAKER, jnp.int32)
    spker_embeds = jax.random.normal(k_emb, (B, SPEAKER_DIM), jnp.float32)

    # --- branch 1: embedder_type == 'embedding'  (nn.Embedding lookup) -----
    out_emb = speaker_embedding_forward(params, speakers, spker_embeds, "embedding")
    out_emb = jax.block_until_ready(out_emb)
    ref_emb = params["emb_table"][speakers]
    assert out_emb.shape == (B, ENCODER_DIM), out_emb.shape
    np.testing.assert_allclose(np.asarray(out_emb), np.asarray(ref_emb),
                               rtol=0.0, atol=0.0)

    # --- branch 2: pretrained embedder           (nn.Linear projection) ----
    out_lin = speaker_embedding_forward(params, speakers, spker_embeds, "pretrained")
    out_lin = jax.block_until_ready(out_lin)
    ref_lin = (
        jnp.dot(spker_embeds.astype(jnp.bfloat16).astype(jnp.float32),
                params["lin_w_bf16"].astype(jnp.float32),
                preferred_element_type=jnp.float32)
        + params["lin_b"]
    )
    assert out_lin.shape == (B, ENCODER_DIM), out_lin.shape
    np.testing.assert_allclose(np.asarray(out_lin), np.asarray(ref_lin),
                               rtol=2e-3, atol=2e-3)

    print("KERNEL_OK")
</pallas_src>

<mosaic_0001>
module attributes {stable_mosaic.version = 11 : i64} {
  func.func @_embedding_lookup_kernel(%arg0: memref<2xi32, #tpu.memory_space<smem>>, %arg1: memref<8x1x256xf32, #tpu.memory_space<vmem>>, %arg2: memref<2x256xf32, #tpu.memory_space<vmem>>) attributes {dimension_semantics = [], scalar_prefetch = 0 : i64, scratch_operands = 0 : i64, tpu.core_type = #tpu.core_type<tc>} {
    %c0 = arith.constant 0 : index
    %0 = memref.load %arg0[%c0] : memref<2xi32, #tpu.memory_space<smem>>
    %1 = arith.index_cast %0 : i32 to index
    %c0_0 = arith.constant 0 : index
    %c0_1 = arith.constant 0 : index
    %2 = vector.load %arg1[%1, %c0_0, %c0_1] : memref<8x1x256xf32, #tpu.memory_space<vmem>>, vector<1x1x256xf32>
    %3 = vector.shape_cast %2 : vector<1x1x256xf32> to vector<1x256xf32>
    %c0_2 = arith.constant 0 : index
    %c0_3 = arith.constant 0 : index
    %4 = vector.load %arg2[%c0_2, %c0_3] : memref<2x256xf32, #tpu.memory_space<vmem>>, vector<1x256xf32>
    tpu.vector_store %arg2[%c0_2, %c0_3], %3 {strides = array<i32>} : memref<2x256xf32, #tpu.memory_space<vmem>>, vector<1x256xf32>,
    %c1 = arith.constant 1 : index
    %5 = memref.load %arg0[%c1] : memref<2xi32, #tpu.memory_space<smem>>
    %6 = arith.index_cast %5 : i32 to index
    %c0_4 = arith.constant 0 : index
    %c0_5 = arith.constant 0 : index
    %7 = vector.load %arg1[%6, %c0_4, %c0_5] : memref<8x1x256xf32, #tpu.memory_space<vmem>>, vector<1x1x256xf32>
    %8 = vector.shape_cast %7 : vector<1x1x256xf32> to vector<1x256xf32>
    %c1_6 = arith.constant 1 : index
    %c0_7 = arith.constant 0 : index
    %9 = vector.load %arg2[%c1_6, %c0_7] : memref<2x256xf32, #tpu.memory_space<vmem>>, vector<1x256xf32>
    tpu.vector_store %arg2[%c1_6, %c0_7], %8 {strides = array<i32>} : memref<2x256xf32, #tpu.memory_space<vmem>>, vector<1x256xf32>,
    return
  }
}

</mosaic_0001>

<bundles_post_ra>
// kernel: tpu_custom_call.1
= control target key start
LH: loop header
LB: loop body
LE: loop exit
PB: predicated region body
PF: predicated region fallthrough
CT: control target
= control target key end

     0   :  { %7 = vsyncpa [#allocation5], 0  ;;  %s181_s0 = inlined_call_operand.hbm [shape: s32[2], index: 0, kind: input, shape index: {}]   ;;  %s182_s1 = inlined_call_operand.hbm [shape: f32[8,1,256], index: 1, kind: input, shape index: {}]   ;;  %s183_s2 = inlined_call_operand.hbm [shape: f32[2,256], index: 2, kind: output, shape index: {}]  }
   0x1   :  { %8 = vsyncpa [#allocation3], 0 }
   0x2   :  { %9 = vsyncpa [#allocation4], 0  ;;  %s15_s11 = sshll.u32 %s181_s0, 4  ;;  %s23_s14 = sshll.u32 %s182_s1, 4  ;;  %s16_s11 = int_to_ptr.hbm [resolvable:$true] %s15_s11  ;;  %s24_s14 = int_to_ptr.hbm [resolvable:$true] %s23_s14 }
   0x3   :  { %s152_s15 = smov [#allocation2]   ;;  %s153_s16 = smov [#allocation6]  }
   0x4   :  { %18 = dma.hbm_to_smem %s16_s11, 16, %s152_s15, [#allocation5]  }
   0x5   :  { %s25_s17 = sshll.u32 %s153_s16, 4  ;;  %s154_s18 = smov 32   ;;  %s26_s17 = int_to_ptr.vmem [resolvable:$true] %s25_s17 }
   0x6   :  { %s155_s19 = smov 2  }
   0x7   :  { %31 = dma.hbm_to_vmem [thread:$0]  %s24_s14, 256, %s26_s17, [#allocation3], %s154_s18, %s154_s18, %s155_s19  }
   0x8   :  { %146 = dma.done.wait [#allocation5], 16  }
   0x9   :  { %147 = vsyncadd [#allocation5], 4294967280 }
   0xa   :  { %148 = dma.done.wait [#allocation3], 256  }
   0xb   :  { %149 = vsyncadd [#allocation3], 4294967040 }
   0xc   :  { %40 = sfence }
   0xd   :  { %s41_s0 = sld [smem:[#allocation2]]  ;;  %v45_v0 = vlaneseq  ;;  %s156_s21 = smov [#allocation7]  }
   0xe   :  { %s79_s20 = sld [smem:[#allocation2 + $0x1]]  ;;  %s61_s22 = sshll.u32 %s156_s21, 4  ;;  %s62_s22 = int_to_ptr.vmem [resolvable:$true] %s61_s22 }
   0xf   :  { %s63_s24 = sshll.u32 %s183_s2, 4  ;;  %vm47_vm0 = vcmp.lt.s32.totalorder %v45_v0, 256  ;;  %s64_s24 = int_to_ptr.hbm [resolvable:$true] %s63_s24 }
  0x13   :  { %s78_s25 = sshll.u32 %s41_s0, 1 }
  0x14   :  { %s80_s26 = sshll.u32 %s79_s20, 1  ;;  %s43_s27 = scalar_lea.vmem [#allocation6], %s78_s25 }
  0x15   :  { %v44_v1 = vld [vmem:[%s43_s27] sm:$0x3]  ;;  %s52_s28 = scalar_lea.vmem [#allocation6], %s80_s26 }
  0x16   :  { %49 = vst.msk [vmem:[#allocation7] ss:$2 sm:$0x3] %vm47_vm0, %v44_v1  ;;  %v53_v2 = vld [vmem:[%s52_s28] sm:$0x3] }
  0x17   :  { %55 = vst.msk [vmem:[#allocation7 + $0x1] ss:$2 sm:$0x3] %vm47_vm0, %v53_v2 }
  0x18   :  { %66 = dma.vmem_to_hbm [thread:$0]  %s62_s22, 64, %s64_s24, [#allocation4]  }
  0x19   :  { %150 = dma.done.wait [#allocation4], 64  }
  0x1a   :  { %151 = vsyncadd [#allocation4], 4294967232 }
  0x1b   :  { %71 = vsyncpa [#allocation3], 1 }
  0x1c   :  { %72 = vsyncpa [#allocation4], 1 }
  0x1d   :  { %73 = vsyncpa [#allocation5], 1 }

</bundles_post_ra>
